<compile_context>
chip_gen: v7x
topology: tpu7x:2x2x1
jax: 0.10.0
libtpu: 0.0.40
codegen_flags: <defaults>
</compile_context>

<pallas_src>
import functools
import math

import jax
import jax.numpy as jnp
from jax.experimental import pallas as pl
from jax.experimental.pallas import tpu as pltpu


# ------------------------------ helpers (in-kernel) ------------------------------

def _ln(x, g, b, eps):
    """LayerNorm over the last axis, f32 math. g/b are (1, H)."""
    mu = jnp.mean(x, axis=-1, keepdims=True)
    xc = x - mu
    var = jnp.mean(xc * xc, axis=-1, keepdims=True)
    return xc * jax.lax.rsqrt(var + eps) * g + b


# ------------------------------ Pallas kernels ------------------------------

def _layernorm_kernel(x_ref, g_ref, b_ref, o_ref, *, eps):
    """LayerNorm(x) -- no-residual variant (embedding LN)."""
    y = _ln(x_ref[...].astype(jnp.float32),
            g_ref[...].astype(jnp.float32),
            b_ref[...].astype(jnp.float32), eps)
    o_ref[...] = y.astype(o_ref.dtype)


def _encoder_layer_kernel(x_ref, mask_ref,
                          wqkv_ref, bqkv_ref, wo_ref, bo_ref, ln1g_ref, ln1b_ref,
                          w1_ref, b1_ref, w2_ref, b2_ref, ln2g_ref, ln2b_ref,
                          o_ref, *, num_heads, head_dim, scale, eps):
    """One full BERT encoder layer for one batch element (grid over batch)."""
    x = x_ref[0]                      # (S, H) bf16
    S, H = x.shape
    mask = mask_ref[0]                # (1, S) additive mask, f32

    # ---- fused QKV projection: one bf16 matmul, f32 accumulation ----
    qkv = jnp.dot(x, wqkv_ref[...], preferred_element_type=jnp.float32)
    qkv = qkv + bqkv_ref[...]         # (S, 3H) f32

    # ---- per-head attention (heads split in-kernel; num_heads is static) ----
    ctx_heads = []
    for h in range(num_heads):
        lo = h * head_dim
        qh = qkv[:, lo:lo + head_dim].astype(jnp.bfloat16)                    # (S, Dh)
        kh = qkv[:, H + lo:H + lo + head_dim].astype(jnp.bfloat16)            # (S, Dh)
        vh = qkv[:, 2 * H + lo:2 * H + lo + head_dim].astype(jnp.bfloat16)    # (S, Dh)
        # q @ k^T without an explicit transpose (contract last dims of both).
        s = jax.lax.dot_general(qh, kh, (((1,), (1,)), ((), ())),
                                preferred_element_type=jnp.float32) * scale
        s = s + mask                                                          # broadcast rows
        s = s - jnp.max(s, axis=-1, keepdims=True)
        p = jnp.exp(s)
        p = p * pl.reciprocal(jnp.sum(p, axis=-1, keepdims=True), approx=True)
        ctx_heads.append(jnp.dot(p.astype(jnp.bfloat16), vh,
                                 preferred_element_type=jnp.float32))         # (S, Dh)
    ctx = jnp.concatenate(ctx_heads, axis=-1)                                 # (S, H) f32

    # ---- output projection + residual + LN1 ----
    attn = jnp.dot(ctx.astype(jnp.bfloat16), wo_ref[...],
                   preferred_element_type=jnp.float32) + bo_ref[...]
    y = _ln(attn + x.astype(jnp.float32), ln1g_ref[...], ln1b_ref[...], eps)  # (S, H) f32

    # ---- FFN: w1 + GELU + w2 + residual + LN2 ----
    hdn = jnp.dot(y.astype(jnp.bfloat16), w1_ref[...],
                  preferred_element_type=jnp.float32) + b1_ref[...]
    # TODO(synk): HF BERT uses exact erf-GELU; tanh approximation used here.
    hdn = jax.nn.gelu(hdn, approximate=True)
    ff = jnp.dot(hdn.astype(jnp.bfloat16), w2_ref[...],
                 preferred_element_type=jnp.float32) + b2_ref[...]
    z = _ln(ff + y, ln2g_ref[...], ln2b_ref[...], eps)

    o_ref[0] = z.astype(o_ref.dtype)


def _head_kernel(x_ref, pw_ref, pb_ref, cw_ref, cb_ref, o_ref):
    """BertPooler (tanh(W x_cls + b)) + classifier, fused. Output lane-padded."""
    x_cls = x_ref[:, 0, :]            # (B, H) bf16 -- CLS token only is DMA'd
    pooled = jnp.tanh(jnp.dot(x_cls, pw_ref[...],
                              preferred_element_type=jnp.float32) + pb_ref[...])
    logits = jnp.dot(pooled.astype(jnp.bfloat16), cw_ref[...],
                     preferred_element_type=jnp.float32) + cb_ref[...]
    o_ref[...] = logits.astype(o_ref.dtype)


# ------------------------------ wrappers ------------------------------

def layernorm_rows(x2d, gamma, beta, *, eps=1e-12, out_dtype=jnp.bfloat16):
    """Row-blocked LayerNorm over the hidden axis (no residual)."""
    M, H = x2d.shape
    tm = M if M <= 512 else 512
    return pl.pallas_call(
        functools.partial(_layernorm_kernel, eps=eps),
        out_shape=jax.ShapeDtypeStruct((M, H), out_dtype),
        grid=(pl.cdiv(M, tm),),
        in_specs=[pl.BlockSpec((tm, H), lambda i: (i, 0)),
                  pl.BlockSpec((1, H), lambda i: (0, 0)),
                  pl.BlockSpec((1, H), lambda i: (0, 0))],
        out_specs=pl.BlockSpec((tm, H), lambda i: (i, 0)),
        compiler_params=pltpu.CompilerParams(dimension_semantics=("parallel",)),
    )(x2d, gamma, beta)


def encoder_layer(x, add_mask, layer, *, num_heads, head_dim, scale, eps=1e-12):
    """x: (B, S, H) bf16; add_mask: (B, 1, S) f32 additive. Returns (B, S, H) bf16."""
    B, S, H = x.shape
    I = layer["w1"].shape[1]
    kernel = functools.partial(_encoder_layer_kernel, num_heads=num_heads,
                               head_dim=head_dim, scale=scale, eps=eps)

    def const_spec(shape):
        # Constant block index -> weight stays resident in VMEM across grid steps.
        return pl.BlockSpec(shape, lambda b: (0, 0))

    return pl.pallas_call(
        kernel,
        out_shape=jax.ShapeDtypeStruct((B, S, H), jnp.bfloat16),
        grid=(B,),
        in_specs=[
            pl.BlockSpec((1, S, H), lambda b: (b, 0, 0)),   # x
            pl.BlockSpec((1, 1, S), lambda b: (b, 0, 0)),   # additive mask
            const_spec((H, 3 * H)), const_spec((1, 3 * H)),  # wqkv, bqkv
            const_spec((H, H)), const_spec((1, H)),          # wo, bo
            const_spec((1, H)), const_spec((1, H)),          # ln1 gamma, beta
            const_spec((H, I)), const_spec((1, I)),          # w1, b1
            const_spec((I, H)), const_spec((1, H)),          # w2, b2
            const_spec((1, H)), const_spec((1, H)),          # ln2 gamma, beta
        ],
        out_specs=pl.BlockSpec((1, S, H), lambda b: (b, 0, 0)),
        compiler_params=pltpu.CompilerParams(dimension_semantics=("parallel",)),
    )(x, add_mask,
      layer["wqkv"], layer["bqkv"], layer["wo"], layer["bo"],
      layer["ln1_g"], layer["ln1_b"],
      layer["w1"], layer["b1"], layer["w2"], layer["b2"],
      layer["ln2_g"], layer["ln2_b"])


def pooler_classifier(x, pooler_w, pooler_b, cls_w, cls_b):
    """x: (B, S, H) bf16 -> lane-padded logits (B, C_pad) f32.

    Only the CLS-token slab (B, 1, H) is handed to the kernel so the DMA is
    B*H instead of B*S*H.
    """
    x_cls = jax.lax.slice_in_dim(x, 0, 1, axis=1)     # (B, 1, H) bf16
    B = x_cls.shape[0]
    Cp = cls_w.shape[1]
    return pl.pallas_call(
        _head_kernel,
        out_shape=jax.ShapeDtypeStruct((B, Cp), jnp.float32),
    )(x_cls, pooler_w, pooler_b, cls_w, cls_b)


# ------------------------------ parameter setup ------------------------------

_CLS_PAD = 128  # lane-dense classifier output; real classes sliced out afterwards


def init_params(key, cfg):
    H, I, V = cfg["hidden"], cfg["intermediate"], cfg["vocab"]
    P, L, C = cfg["max_pos"], cfg["layers"], cfg["num_classes"]
    keys = jax.random.split(key, 8 + L)

    def w(k, shape):
        return jax.random.normal(k, shape, jnp.float32) * 0.02

    cls_w = w(keys[4], (H, C))
    cls_w_pad = jnp.zeros((H, _CLS_PAD), jnp.float32).at[:, :C].set(cls_w)

    params = dict(
        word_emb=w(keys[0], (V, H)),
        pos_emb=w(keys[1], (P, H)),
        type_emb=w(keys[2], (2, H)),
        emb_ln_g=jnp.ones((1, H), jnp.float32),
        emb_ln_b=jnp.zeros((1, H), jnp.float32),
        pooler_w=w(keys[3], (H, H)).astype(jnp.bfloat16),
        pooler_b=jnp.zeros((1, H), jnp.float32),
        cls_w=cls_w_pad.astype(jnp.bfloat16),
        cls_b=jnp.zeros((1, _CLS_PAD), jnp.float32),
        layers=[],
    )
    for l in range(L):
        lk = jax.random.split(keys[8 + l], 6)
        wq, wk, wv = w(lk[0], (H, H)), w(lk[1], (H, H)), w(lk[2], (H, H))
        params["layers"].append(dict(
            wqkv=jnp.concatenate([wq, wk, wv], axis=1).astype(jnp.bfloat16),
            bqkv=jnp.zeros((1, 3 * H), jnp.float32),
            wo=w(lk[3], (H, H)).astype(jnp.bfloat16),
            bo=jnp.zeros((1, H), jnp.float32),
            ln1_g=jnp.ones((1, H), jnp.float32), ln1_b=jnp.zeros((1, H), jnp.float32),
            w1=w(lk[4], (H, I)).astype(jnp.bfloat16), b1=jnp.zeros((1, I), jnp.float32),
            w2=w(lk[5], (I, H)).astype(jnp.bfloat16), b2=jnp.zeros((1, H), jnp.float32),
            ln2_g=jnp.ones((1, H), jnp.float32), ln2_b=jnp.zeros((1, H), jnp.float32),
        ))
    return params


# ------------------------------- forward pass -------------------------------

def bert_classifier_forward(params, input_ids, attention_mask, cfg):
    B, S = input_ids.shape
    H, nH = cfg["hidden"], cfg["heads"]
    Dh = H // nH
    scale = 1.0 / math.sqrt(Dh)

    # Embeddings (gather + adds are XLA glue; LayerNorm runs in Pallas).
    # TODO(synk): token_type_ids hard-coded to 0 (matches the reference usage).
    emb = (jnp.take(params["word_emb"], input_ids, axis=0)
           + params["pos_emb"][:S][None, :, :]
           + params["type_emb"][0][None, None, :])                       # (B, S, H) f32
    x = layernorm_rows(emb.reshape(B * S, H),
                       params["emb_ln_g"], params["emb_ln_b"]).reshape(B, S, H)

    # Additive attention mask: (B, 1, S), 0 for keep / -1e9 for masked.
    add_mask = ((1.0 - attention_mask.astype(jnp.float32)) * -1e9).reshape(B, 1, S)

    for layer in params["layers"]:
        x = encoder_layer(x, add_mask, layer,
                          num_heads=nH, head_dim=Dh, scale=scale)         # (B, S, H) bf16

    logits_pad = pooler_classifier(x, params["pooler_w"], params["pooler_b"],
                                   params["cls_w"], params["cls_b"])      # (B, 128) f32
    return logits_pad[:, :cfg["num_classes"]]


# ----------------------------------- main ------------------------------------

if __name__ == "__main__":
    cfg = dict(vocab=64, hidden=32, heads=2, intermediate=64, layers=2,
               max_pos=16, num_classes=6)
    B, S = 2, 8

    key = jax.random.PRNGKey(0)
    pkey, ikey = jax.random.split(key)

    params = init_params(pkey, cfg)
    input_ids = jax.random.randint(ikey, (B, S), 0, cfg["vocab"], dtype=jnp.int32)
    attention_mask = jnp.ones((B, S), jnp.int32).at[1, S - 2:].set(0)

    fwd = jax.jit(lambda p, ids, mask: bert_classifier_forward(p, ids, mask, cfg))
    logits = fwd(params, input_ids, attention_mask)
    jax.block_until_ready(logits)

    assert logits.shape == (B, cfg["num_classes"])
    assert logits.dtype == jnp.float32
    print("KERNEL_OK")
</pallas_src>

<mosaic_0001>
module attributes {stable_mosaic.version = 11 : i64} {
  func.func @_encoder_layer_kernel(%arg0: i32, %arg1: memref<1x8x32xbf16, #tpu.memory_space<vmem>>, %arg2: memref<1x1x8xf32, #tpu.memory_space<vmem>>, %arg3: memref<32x96xbf16, #tpu.memory_space<vmem>>, %arg4: memref<1x96xf32, #tpu.memory_space<vmem>>, %arg5: memref<32x32xbf16, #tpu.memory_space<vmem>>, %arg6: memref<1x32xf32, #tpu.memory_space<vmem>>, %arg7: memref<1x32xf32, #tpu.memory_space<vmem>>, %arg8: memref<1x32xf32, #tpu.memory_space<vmem>>, %arg9: memref<32x64xbf16, #tpu.memory_space<vmem>>, %arg10: memref<1x64xf32, #tpu.memory_space<vmem>>, %arg11: memref<64x32xbf16, #tpu.memory_space<vmem>>, %arg12: memref<1x32xf32, #tpu.memory_space<vmem>>, %arg13: memref<1x32xf32, #tpu.memory_space<vmem>>, %arg14: memref<1x32xf32, #tpu.memory_space<vmem>>, %arg15: memref<1x8x32xbf16, #tpu.memory_space<vmem>>) attributes {dimension_semantics = [#tpu.dimension_semantics<parallel>], iteration_bounds = array<i64: 2>, scalar_prefetch = 0 : i64, scratch_operands = 0 : i64, tpu.core_type = #tpu.core_type<tc>, window_params = [{transform_indices = @transform_0, window_bounds = array<i64: 1, 8, 32>}, {transform_indices = @transform_1, window_bounds = array<i64: 1, 1, 8>}, {pipeline_mode = #tpu.pipeline_mode<synchronous>, transform_indices = @transform_2, window_bounds = array<i64: 32, 96>}, {pipeline_mode = #tpu.pipeline_mode<synchronous>, transform_indices = @transform_3, window_bounds = array<i64: 1, 96>}, {pipeline_mode = #tpu.pipeline_mode<synchronous>, transform_indices = @transform_4, window_bounds = array<i64: 32, 32>}, {pipeline_mode = #tpu.pipeline_mode<synchronous>, transform_indices = @transform_5, window_bounds = array<i64: 1, 32>}, {pipeline_mode = #tpu.pipeline_mode<synchronous>, transform_indices = @transform_6, window_bounds = array<i64: 1, 32>}, {pipeline_mode = #tpu.pipeline_mode<synchronous>, transform_indices = @transform_7, window_bounds = array<i64: 1, 32>}, {pipeline_mode = #tpu.pipeline_mode<synchronous>, transform_indices = @transform_8, window_bounds = array<i64: 32, 64>}, {pipeline_mode = #tpu.pipeline_mode<synchronous>, transform_indices = @transform_9, window_bounds = array<i64: 1, 64>}, {pipeline_mode = #tpu.pipeline_mode<synchronous>, transform_indices = @transform_10, window_bounds = array<i64: 64, 32>}, {pipeline_mode = #tpu.pipeline_mode<synchronous>, transform_indices = @transform_11, window_bounds = array<i64: 1, 32>}, {pipeline_mode = #tpu.pipeline_mode<synchronous>, transform_indices = @transform_12, window_bounds = array<i64: 1, 32>}, {pipeline_mode = #tpu.pipeline_mode<synchronous>, transform_indices = @transform_13, window_bounds = array<i64: 1, 32>}, {transform_indices = @transform_14, window_bounds = array<i64: 1, 8, 32>}]} {
    %c0 = arith.constant 0 : index
    %c0_0 = arith.constant 0 : index
    %c0_1 = arith.constant 0 : index
    %0 = vector.load %arg1[%c0, %c0_0, %c0_1] : memref<1x8x32xbf16, #tpu.memory_space<vmem>>, vector<1x8x32xbf16>
    %1 = vector.shape_cast %0 : vector<1x8x32xbf16> to vector<8x32xbf16>
    %c0_2 = arith.constant 0 : index
    %c0_3 = arith.constant 0 : index
    %c0_4 = arith.constant 0 : index
    %2 = vector.load %arg2[%c0_2, %c0_3, %c0_4] : memref<1x1x8xf32, #tpu.memory_space<vmem>>, vector<1x1x8xf32>
    %3 = vector.shape_cast %2 : vector<1x1x8xf32> to vector<1x8xf32>
    %c0_5 = arith.constant 0 : index
    %c0_6 = arith.constant 0 : index
    %4 = vector.load %arg3[%c0_5, %c0_6] : memref<32x96xbf16, #tpu.memory_space<vmem>>, vector<32x96xbf16>
    %cst = arith.constant dense<0.000000e+00> : vector<8x96xf32>
    %5 = tpu.matmul %1, %4, %cst {dimension_numbers = #tpu.dot_dimension_numbers<[1], [0], [0], [1], [0, 0, 1, 1], [], []>} : vector<8x32xbf16>, vector<32x96xbf16>, vector<8x96xf32> -> vector<8x96xf32>
    %c0_7 = arith.constant 0 : index
    %c0_8 = arith.constant 0 : index
    %6 = vector.load %arg4[%c0_7, %c0_8] : memref<1x96xf32, #tpu.memory_space<vmem>>, vector<1x96xf32>
    %7 = vector.broadcast %6 : vector<1x96xf32> to vector<8x96xf32>
    %8 = arith.addf %5, %7 : vector<8x96xf32>
    %9 = vector.extract_strided_slice %8 {offsets = [0, 0], sizes = [8, 16], strides = [1, 1]} : vector<8x96xf32> to vector<8x16xf32>
    %10 = arith.truncf %9 : vector<8x16xf32> to vector<8x16xbf16>
    %11 = vector.extract_strided_slice %8 {offsets = [0, 32], sizes = [8, 16], strides = [1, 1]} : vector<8x96xf32> to vector<8x16xf32>
    %12 = arith.truncf %11 : vector<8x16xf32> to vector<8x16xbf16>
    %13 = vector.extract_strided_slice %8 {offsets = [0, 64], sizes = [8, 16], strides = [1, 1]} : vector<8x96xf32> to vector<8x16xf32>
    %14 = arith.truncf %13 : vector<8x16xf32> to vector<8x16xbf16>
    %cst_9 = arith.constant dense<0.000000e+00> : vector<8x8xf32>
    %15 = tpu.matmul %10, %12, %cst_9 {dimension_numbers = #tpu.dot_dimension_numbers<[1], [1], [0], [0], [0, 0, 1, 0], [], []>} : vector<8x16xbf16>, vector<8x16xbf16>, vector<8x8xf32> -> vector<8x8xf32>
    %cst_10 = arith.constant 2.500000e-01 : f32
    %16 = vector.broadcast %cst_10 : f32 to vector<8x8xf32>
    %17 = arith.mulf %15, %16 : vector<8x8xf32>
    %18 = vector.broadcast %3 : vector<1x8xf32> to vector<8x8xf32>
    %19 = arith.addf %17, %18 : vector<8x8xf32>
    %cst_11 = arith.constant dense<0xFF800000> : vector<8xf32>
    %20 = vector.multi_reduction <maximumf>, %19, %cst_11 [1] : vector<8x8xf32> to vector<8xf32>
    %21 = vector.shape_cast %20 : vector<8xf32> to vector<8x1xf32>
    %22 = vector.broadcast %21 : vector<8x1xf32> to vector<8x8xf32>
    %23 = arith.subf %19, %22 : vector<8x8xf32>
    %24 = math.exp %23 : vector<8x8xf32>
    %cst_12 = arith.constant dense<0.000000e+00> : vector<8xf32>
    %25 = vector.multi_reduction <add>, %24, %cst_12 [1] : vector<8x8xf32> to vector<8xf32>
    %26 = vector.shape_cast %25 : vector<8xf32> to vector<8x1xf32>
    %27 = tpu.reciprocal %26 {approx = true} : vector<8x1xf32> -> vector<8x1xf32>
    %28 = vector.broadcast %27 : vector<8x1xf32> to vector<8x8xf32>
    %29 = arith.mulf %24, %28 : vector<8x8xf32>
    %30 = arith.truncf %29 : vector<8x8xf32> to vector<8x8xbf16>
    %cst_13 = arith.constant dense<0.000000e+00> : vector<8x16xf32>
    %31 = tpu.matmul %30, %14, %cst_13 {dimension_numbers = #tpu.dot_dimension_numbers<[1], [0], [0], [1], [0, 0, 1, 1], [], []>} : vector<8x8xbf16>, vector<8x16xbf16>, vector<8x16xf32> -> vector<8x16xf32>
    %32 = vector.extract_strided_slice %8 {offsets = [0, 16], sizes = [8, 16], strides = [1, 1]} : vector<8x96xf32> to vector<8x16xf32>
    %33 = arith.truncf %32 : vector<8x16xf32> to vector<8x16xbf16>
    %34 = vector.extract_strided_slice %8 {offsets = [0, 48], sizes = [8, 16], strides = [1, 1]} : vector<8x96xf32> to vector<8x16xf32>
    %35 = arith.truncf %34 : vector<8x16xf32> to vector<8x16xbf16>
    %36 = vector.extract_strided_slice %8 {offsets = [0, 80], sizes = [8, 16], strides = [1, 1]} : vector<8x96xf32> to vector<8x16xf32>
    %37 = arith.truncf %36 : vector<8x16xf32> to vector<8x16xbf16>
    %cst_14 = arith.constant dense<0.000000e+00> : vector<8x8xf32>
    %38 = tpu.matmul %33, %35, %cst_14 {dimension_numbers = #tpu.dot_dimension_numbers<[1], [1], [0], [0], [0, 0, 1, 0], [], []>} : vector<8x16xbf16>, vector<8x16xbf16>, vector<8x8xf32> -> vector<8x8xf32>
    %cst_15 = arith.constant 2.500000e-01 : f32
    %39 = vector.broadcast %cst_15 : f32 to vector<8x8xf32>
    %40 = arith.mulf %38, %39 : vector<8x8xf32>
    %41 = vector.broadcast %3 : vector<1x8xf32> to vector<8x8xf32>
    %42 = arith.addf %40, %41 : vector<8x8xf32>
    %cst_16 = arith.constant dense<0xFF800000> : vector<8xf32>
    %43 = vector.multi_reduction <maximumf>, %42, %cst_16 [1] : vector<8x8xf32> to vector<8xf32>
    %44 = vector.shape_cast %43 : vector<8xf32> to vector<8x1xf32>
    %45 = vector.broadcast %44 : vector<8x1xf32> to vector<8x8xf32>
    %46 = arith.subf %42, %45 : vector<8x8xf32>
    %47 = math.exp %46 : vector<8x8xf32>
    %cst_17 = arith.constant dense<0.000000e+00> : vector<8xf32>
    %48 = vector.multi_reduction <add>, %47, %cst_17 [1] : vector<8x8xf32> to vector<8xf32>
    %49 = vector.shape_cast %48 : vector<8xf32> to vector<8x1xf32>
    %50 = tpu.reciprocal %49 {approx = true} : vector<8x1xf32> -> vector<8x1xf32>
    %51 = vector.broadcast %50 : vector<8x1xf32> to vector<8x8xf32>
    %52 = arith.mulf %47, %51 : vector<8x8xf32>
    %53 = arith.truncf %52 : vector<8x8xf32> to vector<8x8xbf16>
    %cst_18 = arith.constant dense<0.000000e+00> : vector<8x16xf32>
    %54 = tpu.matmul %53, %37, %cst_18 {dimension_numbers = #tpu.dot_dimension_numbers<[1], [0], [0], [1], [0, 0, 1, 1], [], []>} : vector<8x8xbf16>, vector<8x16xbf16>, vector<8x16xf32> -> vector<8x16xf32>
    %55 = tpu.concatenate %31, %54 in 1 : vector<8x16xf32>, vector<8x16xf32> -> vector<8x32xf32>
    %56 = arith.truncf %55 : vector<8x32xf32> to vector<8x32xbf16>
    %c0_19 = arith.constant 0 : index
    %c0_20 = arith.constant 0 : index
    %57 = vector.load %arg5[%c0_19, %c0_20] : memref<32x32xbf16, #tpu.memory_space<vmem>>, vector<32x32xbf16>
    %cst_21 = arith.constant dense<0.000000e+00> : vector<8x32xf32>
    %58 = tpu.matmul %56, %57, %cst_21 {dimension_numbers = #tpu.dot_dimension_numbers<[1], [0], [0], [1], [0, 0, 1, 1], [], []>} : vector<8x32xbf16>, vector<32x32xbf16>, vector<8x32xf32> -> vector<8x32xf32>
    %c0_22 = arith.constant 0 : index
    %c0_23 = arith.constant 0 : index
    %59 = vector.load %arg6[%c0_22, %c0_23] : memref<1x32xf32, #tpu.memory_space<vmem>>, vector<1x32xf32>
    %60 = vector.broadcast %59 : vector<1x32xf32> to vector<8x32xf32>
    %61 = arith.addf %58, %60 : vector<8x32xf32>
    %62 = arith.extf %1 : vector<8x32xbf16> to vector<8x32xf32>
    %63 = arith.addf %61, %62 : vector<8x32xf32>
    %c0_24 = arith.constant 0 : index
    %c0_25 = arith.constant 0 : index
    %64 = vector.load %arg7[%c0_24, %c0_25] : memref<1x32xf32, #tpu.memory_space<vmem>>, vector<1x32xf32>
    %c0_26 = arith.constant 0 : index
    %c0_27 = arith.constant 0 : index
    %65 = vector.load %arg8[%c0_26, %c0_27] : memref<1x32xf32, #tpu.memory_space<vmem>>, vector<1x32xf32>
    %cst_28 = arith.constant dense<0.000000e+00> : vector<8xf32>
    %66 = vector.multi_reduction <add>, %63, %cst_28 [1] : vector<8x32xf32> to vector<8xf32>
    %67 = vector.shape_cast %66 : vector<8xf32> to vector<8x1xf32>
    %cst_29 = arith.constant 3.200000e+01 : f32
    %68 = vector.broadcast %cst_29 : f32 to vector<8x1xf32>
    %69 = arith.divf %67, %68 : vector<8x1xf32>
    %70 = vector.broadcast %69 : vector<8x1xf32> to vector<8x32xf32>
    %71 = arith.subf %63, %70 : vector<8x32xf32>
    %72 = arith.mulf %71, %71 : vector<8x32xf32>
    %cst_30 = arith.constant dense<0.000000e+00> : vector<8xf32>
    %73 = vector.multi_reduction <add>, %72, %cst_30 [1] : vector<8x32xf32> to vector<8xf32>
    %74 = vector.shape_cast %73 : vector<8xf32> to vector<8x1xf32>
    %cst_31 = arith.constant 3.200000e+01 : f32
    %75 = vector.broadcast %cst_31 : f32 to vector<8x1xf32>
    %76 = arith.divf %74, %75 : vector<8x1xf32>
    %cst_32 = arith.constant 9.99999996E-13 : f32
    %77 = vector.broadcast %cst_32 : f32 to vector<8x1xf32>
    %78 = arith.addf %76, %77 : vector<8x1xf32>
    %79 = math.rsqrt %78 : vector<8x1xf32>
    %80 = vector.broadcast %79 : vector<8x1xf32> to vector<8x32xf32>
    %81 = arith.mulf %71, %80 : vector<8x32xf32>
    %82 = vector.broadcast %64 : vector<1x32xf32> to vector<8x32xf32>
    %83 = arith.mulf %81, %82 : vector<8x32xf32>
    %84 = vector.broadcast %65 : vector<1x32xf32> to vector<8x32xf32>
    %85 = arith.addf %83, %84 : vector<8x32xf32>
    %86 = arith.truncf %85 : vector<8x32xf32> to vector<8x32xbf16>
    %c0_33 = arith.constant 0 : index
    %c0_34 = arith.constant 0 : index
    %87 = vector.load %arg9[%c0_33, %c0_34] : memref<32x64xbf16, #tpu.memory_space<vmem>>, vector<32x64xbf16>
    %cst_35 = arith.constant dense<0.000000e+00> : vector<8x64xf32>
    %88 = tpu.matmul %86, %87, %cst_35 {dimension_numbers = #tpu.dot_dimension_numbers<[1], [0], [0], [1], [0, 0, 1, 1], [], []>} : vector<8x32xbf16>, vector<32x64xbf16>, vector<8x64xf32> -> vector<8x64xf32>
    %c0_36 = arith.constant 0 : index
    %c0_37 = arith.constant 0 : index
    %89 = vector.load %arg10[%c0_36, %c0_37] : memref<1x64xf32, #tpu.memory_space<vmem>>, vector<1x64xf32>
    %90 = vector.broadcast %89 : vector<1x64xf32> to vector<8x64xf32>
    %91 = arith.addf %88, %90 : vector<8x64xf32>
    %92 = arith.mulf %91, %91 : vector<8x64xf32>
    %93 = arith.mulf %91, %92 : vector<8x64xf32>
    %cst_38 = arith.constant 4.471500e-02 : f32
    %94 = vector.broadcast %cst_38 : f32 to vector<8x64xf32>
    %95 = arith.mulf %94, %93 : vector<8x64xf32>
    %96 = arith.addf %91, %95 : vector<8x64xf32>
    %cst_39 = arith.constant 0.797884583 : f32
    %97 = vector.broadcast %cst_39 : f32 to vector<8x64xf32>
    %98 = arith.mulf %97, %96 : vector<8x64xf32>
    %99 = math.tanh %98 : vector<8x64xf32>
    %cst_40 = arith.constant 1.000000e+00 : f32
    %100 = vector.broadcast %cst_40 : f32 to vector<8x64xf32>
    %101 = arith.addf %100, %99 : vector<8x64xf32>
    %cst_41 = arith.constant 5.000000e-01 : f32
    %102 = vector.broadcast %cst_41 : f32 to vector<8x64xf32>
    %103 = arith.mulf %102, %101 : vector<8x64xf32>
    %104 = arith.mulf %91, %103 : vector<8x64xf32>
    %105 = arith.truncf %104 : vector<8x64xf32> to vector<8x64xbf16>
    %c0_42 = arith.constant 0 : index
    %c0_43 = arith.constant 0 : index
    %106 = vector.load %arg11[%c0_42, %c0_43] : memref<64x32xbf16, #tpu.memory_space<vmem>>, vector<64x32xbf16>
    %cst_44 = arith.constant dense<0.000000e+00> : vector<8x32xf32>
    %107 = tpu.matmul %105, %106, %cst_44 {dimension_numbers = #tpu.dot_dimension_numbers<[1], [0], [0], [1], [0, 0, 1, 1], [], []>} : vector<8x64xbf16>, vector<64x32xbf16>, vector<8x32xf32> -> vector<8x32xf32>
    %c0_45 = arith.constant 0 : index
    %c0_46 = arith.constant 0 : index
    %108 = vector.load %arg12[%c0_45, %c0_46] : memref<1x32xf32, #tpu.memory_space<vmem>>, vector<1x32xf32>
    %109 = vector.broadcast %108 : vector<1x32xf32> to vector<8x32xf32>
    %110 = arith.addf %107, %109 : vector<8x32xf32>
    %111 = arith.addf %110, %85 : vector<8x32xf32>
    %c0_47 = arith.constant 0 : index
    %c0_48 = arith.constant 0 : index
    %112 = vector.load %arg13[%c0_47, %c0_48] : memref<1x32xf32, #tpu.memory_space<vmem>>, vector<1x32xf32>
    %c0_49 = arith.constant 0 : index
    %c0_50 = arith.constant 0 : index
    %113 = vector.load %arg14[%c0_49, %c0_50] : memref<1x32xf32, #tpu.memory_space<vmem>>, vector<1x32xf32>
    %cst_51 = arith.constant dense<0.000000e+00> : vector<8xf32>
    %114 = vector.multi_reduction <add>, %111, %cst_51 [1] : vector<8x32xf32> to vector<8xf32>
    %115 = vector.shape_cast %114 : vector<8xf32> to vector<8x1xf32>
    %cst_52 = arith.constant 3.200000e+01 : f32
    %116 = vector.broadcast %cst_52 : f32 to vector<8x1xf32>
    %117 = arith.divf %115, %116 : vector<8x1xf32>
    %118 = vector.broadcast %117 : vector<8x1xf32> to vector<8x32xf32>
    %119 = arith.subf %111, %118 : vector<8x32xf32>
    %120 = arith.mulf %119, %119 : vector<8x32xf32>
    %cst_53 = arith.constant dense<0.000000e+00> : vector<8xf32>
    %121 = vector.multi_reduction <add>, %120, %cst_53 [1] : vector<8x32xf32> to vector<8xf32>
    %122 = vector.shape_cast %121 : vector<8xf32> to vector<8x1xf32>
    %cst_54 = arith.constant 3.200000e+01 : f32
    %123 = vector.broadcast %cst_54 : f32 to vector<8x1xf32>
    %124 = arith.divf %122, %123 : vector<8x1xf32>
    %cst_55 = arith.constant 9.99999996E-13 : f32
    %125 = vector.broadcast %cst_55 : f32 to vector<8x1xf32>
    %126 = arith.addf %124, %125 : vector<8x1xf32>
    %127 = math.rsqrt %126 : vector<8x1xf32>
    %128 = vector.broadcast %127 : vector<8x1xf32> to vector<8x32xf32>
    %129 = arith.mulf %119, %128 : vector<8x32xf32>
    %130 = vector.broadcast %112 : vector<1x32xf32> to vector<8x32xf32>
    %131 = arith.mulf %129, %130 : vector<8x32xf32>
    %132 = vector.broadcast %113 : vector<1x32xf32> to vector<8x32xf32>
    %133 = arith.addf %131, %132 : vector<8x32xf32>
    %134 = arith.truncf %133 : vector<8x32xf32> to vector<8x32xbf16>
    %c0_56 = arith.constant 0 : index
    %c0_57 = arith.constant 0 : index
    %c0_58 = arith.constant 0 : index
    %135 = vector.load %arg15[%c0_56, %c0_57, %c0_58] : memref<1x8x32xbf16, #tpu.memory_space<vmem>>, vector<1x8x32xbf16>
    %136 = vector.shape_cast %135 : vector<1x8x32xbf16> to vector<8x32xbf16>
    %137 = vector.shape_cast %134 : vector<8x32xbf16> to vector<1x8x32xbf16>
    tpu.vector_store %arg15[%c0_56, %c0_57, %c0_58], %137 {strides = array<i32>} : memref<1x8x32xbf16, #tpu.memory_space<vmem>>, vector<1x8x32xbf16>,
    return
  }
  func.func @transform_0(%arg0: i32) -> (i32, i32, i32) {
    %c0_i32 = arith.constant 0 : i32
    %c0_i32_0 = arith.constant 0 : i32
    %c0_i32_1 = arith.constant 0 : i32
    return %arg0, %c0_i32, %c0_i32_0 : i32, i32, i32
  }
  func.func @transform_1(%arg0: i32) -> (i32, i32, i32) {
    %c0_i32 = arith.constant 0 : i32
    %c0_i32_0 = arith.constant 0 : i32
    %c0_i32_1 = arith.constant 0 : i32
    return %arg0, %c0_i32, %c0_i32_0 : i32, i32, i32
  }
  func.func @transform_2(%arg0: i32) -> (i32, i32) {
    %c0_i32 = arith.constant 0 : i32
    %c0_i32_0 = arith.constant 0 : i32
    %c0_i32_1 = arith.constant 0 : i32
    return %c0_i32, %c0_i32_0 : i32, i32
  }
  func.func @transform_3(%arg0: i32) -> (i32, i32) {
    %c0_i32 = arith.constant 0 : i32
    %c0_i32_0 = arith.constant 0 : i32
    %c0_i32_1 = arith.constant 0 : i32
    return %c0_i32, %c0_i32_0 : i32, i32
  }
  func.func @transform_4(%arg0: i32) -> (i32, i32) {
    %c0_i32 = arith.constant 0 : i32
    %c0_i32_0 = arith.constant 0 : i32
    %c0_i32_1 = arith.constant 0 : i32
    return %c0_i32, %c0_i32_0 : i32, i32
  }
  func.func @transform_5(%arg0: i32) -> (i32, i32) {
    %c0_i32 = arith.constant 0 : i32
    %c0_i32_0 = arith.constant 0 : i32
    %c0_i32_1 = arith.constant 0 : i32
    return %c0_i32, %c0_i32_0 : i32, i32
  }
  func.func @transform_6(%arg0: i32) -> (i32, i32) {
    %c0_i32 = arith.constant 0 : i32
    %c0_i32_0 = arith.constant 0 : i32
    %c0_i32_1 = arith.constant 0 : i32
    return %c0_i32, %c0_i32_0 : i32, i32
  }
  func.func @transform_7(%arg0: i32) -> (i32, i32) {
    %c0_i32 = arith.constant 0 : i32
    %c0_i32_0 = arith.constant 0 : i32
    %c0_i32_1 = arith.constant 0 : i32
    return %c0_i32, %c0_i32_0 : i32, i32
  }
  func.func @transform_8(%arg0: i32) -> (i32, i32) {
    %c0_i32 = arith.constant 0 : i32
    %c0_i32_0 = arith.constant 0 : i32
    %c0_i32_1 = arith.constant 0 : i32
    return %c0_i32, %c0_i32_0 : i32, i32
  }
  func.func @transform_9(%arg0: i32) -> (i32, i32) {
    %c0_i32 = arith.constant 0 : i32
    %c0_i32_0 = arith.constant 0 : i32
    %c0_i32_1 = arith.constant 0 : i32
    return %c0_i32, %c0_i32_0 : i32, i32
  }
  func.func @transform_10(%arg0: i32) -> (i32, i32) {
    %c0_i32 = arith.constant 0 : i32
    %c0_i32_0 = arith.constant 0 : i32
    %c0_i32_1 = arith.constant 0 : i32
    return %c0_i32, %c0_i32_0 : i32, i32
  }
  func.func @transform_11(%arg0: i32) -> (i32, i32) {
    %c0_i32 = arith.constant 0 : i32
    %c0_i32_0 = arith.constant 0 : i32
    %c0_i32_1 = arith.constant 0 : i32
    return %c0_i32, %c0_i32_0 : i32, i32
  }
  func.func @transform_12(%arg0: i32) -> (i32, i32) {
    %c0_i32 = arith.constant 0 : i32
    %c0_i32_0 = arith.constant 0 : i32
    %c0_i32_1 = arith.constant 0 : i32
    return %c0_i32, %c0_i32_0 : i32, i32
  }
  func.func @transform_13(%arg0: i32) -> (i32, i32) {
    %c0_i32 = arith.constant 0 : i32
    %c0_i32_0 = arith.constant 0 : i32
    %c0_i32_1 = arith.constant 0 : i32
    return %c0_i32, %c0_i32_0 : i32, i32
  }
  func.func @transform_14(%arg0: i32) -> (i32, i32, i32) {
    %c0_i32 = arith.constant 0 : i32
    %c0_i32_0 = arith.constant 0 : i32
    %c0_i32_1 = arith.constant 0 : i32
    return %arg0, %c0_i32, %c0_i32_0 : i32, i32, i32
  }
}

module attributes {stable_mosaic.version = 11 : i64} {
  func.func @_layernorm_kernel(%arg0: i32, %arg1: memref<16x32xf32, #tpu.memory_space<vmem>>, %arg2: memref<1x32xf32, #tpu.memory_space<vmem>>, %arg3: memref<1x32xf32, #tpu.memory_space<vmem>>, %arg4: memref<16x32xbf16, #tpu.memory_space<vmem>>) attributes {dimension_semantics = [#tpu.dimension_semantics<parallel>], iteration_bounds = array<i64: 1>, scalar_prefetch = 0 : i64, scratch_operands = 0 : i64, tpu.core_type = #tpu.core_type<tc>, window_params = [{transform_indices = @transform_0, window_bounds = array<i64: 16, 32>}, {pipeline_mode = #tpu.pipeline_mode<synchronous>, transform_indices = @transform_1, window_bounds = array<i64: 1, 32>}, {pipeline_mode = #tpu.pipeline_mode<synchronous>, transform_indices = @transform_2, window_bounds = array<i64: 1, 32>}, {transform_indices = @transform_3, window_bounds = array<i64: 16, 32>}]} {
    %c0 = arith.constant 0 : index
    %c0_0 = arith.constant 0 : index
    %0 = vector.load %arg1[%c0, %c0_0] : memref<16x32xf32, #tpu.memory_space<vmem>>, vector<16x32xf32>
    %c0_1 = arith.constant 0 : index
    %c0_2 = arith.constant 0 : index
    %1 = vector.load %arg2[%c0_1, %c0_2] : memref<1x32xf32, #tpu.memory_space<vmem>>, vector<1x32xf32>
    %c0_3 = arith.constant 0 : index
    %c0_4 = arith.constant 0 : index
    %2 = vector.load %arg3[%c0_3, %c0_4] : memref<1x32xf32, #tpu.memory_space<vmem>>, vector<1x32xf32>
    %cst = arith.constant dense<0.000000e+00> : vector<16xf32>
    %3 = vector.multi_reduction <add>, %0, %cst [1] : vector<16x32xf32> to vector<16xf32>
    %4 = vector.shape_cast %3 : vector<16xf32> to vector<16x1xf32>
    %cst_5 = arith.constant 3.200000e+01 : f32
    %5 = vector.broadcast %cst_5 : f32 to vector<16x1xf32>
    %6 = arith.divf %4, %5 : vector<16x1xf32>
    %7 = vector.broadcast %6 : vector<16x1xf32> to vector<16x32xf32>
    %8 = arith.subf %0, %7 : vector<16x32xf32>
    %9 = arith.mulf %8, %8 : vector<16x32xf32>
    %cst_6 = arith.constant dense<0.000000e+00> : vector<16xf32>
    %10 = vector.multi_reduction <add>, %9, %cst_6 [1] : vector<16x32xf32> to vector<16xf32>
    %11 = vector.shape_cast %10 : vector<16xf32> to vector<16x1xf32>
    %cst_7 = arith.constant 3.200000e+01 : f32
    %12 = vector.broadcast %cst_7 : f32 to vector<16x1xf32>
    %13 = arith.divf %11, %12 : vector<16x1xf32>
    %cst_8 = arith.constant 9.99999996E-13 : f32
    %14 = vector.broadcast %cst_8 : f32 to vector<16x1xf32>
    %15 = arith.addf %13, %14 : vector<16x1xf32>
    %16 = math.rsqrt %15 : vector<16x1xf32>
    %17 = vector.broadcast %16 : vector<16x1xf32> to vector<16x32xf32>
    %18 = arith.mulf %8, %17 : vector<16x32xf32>
    %19 = vector.broadcast %1 : vector<1x32xf32> to vector<16x32xf32>
    %20 = arith.mulf %18, %19 : vector<16x32xf32>
    %21 = vector.broadcast %2 : vector<1x32xf32> to vector<16x32xf32>
    %22 = arith.addf %20, %21 : vector<16x32xf32>
    %23 = arith.truncf %22 : vector<16x32xf32> to vector<16x32xbf16>
    %c0_9 = arith.constant 0 : index
    %c0_10 = arith.constant 0 : index
    %24 = vector.load %arg4[%c0_9, %c0_10] : memref<16x32xbf16, #tpu.memory_space<vmem>>, vector<16x32xbf16>
    tpu.vector_store %arg4[%c0_9, %c0_10], %23 {strides = array<i32>} : memref<16x32xbf16, #tpu.memory_space<vmem>>, vector<16x32xbf16>,
    return
  }
  func.func @transform_0(%arg0: i32) -> (i32, i32) {
    %c0_i32 = arith.constant 0 : i32
    %c0_i32_0 = arith.constant 0 : i32
    return %arg0, %c0_i32 : i32, i32
  }
  func.func @transform_1(%arg0: i32) -> (i32, i32) {
    %c0_i32 = arith.constant 0 : i32
    %c0_i32_0 = arith.constant 0 : i32
    %c0_i32_1 = arith.constant 0 : i32
    return %c0_i32, %c0_i32_0 : i32, i32
  }
  func.func @transform_2(%arg0: i32) -> (i32, i32) {
    %c0_i32 = arith.constant 0 : i32
    %c0_i32_0 = arith.constant 0 : i32
    %c0_i32_1 = arith.constant 0 : i32
    return %c0_i32, %c0_i32_0 : i32, i32
  }
  func.func @transform_3(%arg0: i32) -> (i32, i32) {
    %c0_i32 = arith.constant 0 : i32
    %c0_i32_0 = arith.constant 0 : i32
    return %arg0, %c0_i32 : i32, i32
  }
}

module attributes {stable_mosaic.version = 11 : i64} {
  func.func @_head_kernel(%arg0: memref<2x1x32xbf16, #tpu.memory_space<vmem>>, %arg1: memref<32x32xbf16, #tpu.memory_space<vmem>>, %arg2: memref<1x32xf32, #tpu.memory_space<vmem>>, %arg3: memref<32x128xbf16, #tpu.memory_space<vmem>>, %arg4: memref<1x128xf32, #tpu.memory_space<vmem>>, %arg5: memref<2x128xf32, #tpu.memory_space<vmem>>) attributes {dimension_semantics = [], scalar_prefetch = 0 : i64, scratch_operands = 0 : i64, tpu.core_type = #tpu.core_type<tc>} {
    %c0 = arith.constant 0 : index
    %c0_0 = arith.constant 0 : index
    %c0_1 = arith.constant 0 : index
    %0 = vector.load %arg0[%c0, %c0_0, %c0_1] : memref<2x1x32xbf16, #tpu.memory_space<vmem>>, vector<2x1x32xbf16>
    %1 = vector.shape_cast %0 : vector<2x1x32xbf16> to vector<2x32xbf16>
    %c0_2 = arith.constant 0 : index
    %c0_3 = arith.constant 0 : index
    %2 = vector.load %arg1[%c0_2, %c0_3] : memref<32x32xbf16, #tpu.memory_space<vmem>>, vector<32x32xbf16>
    %cst = arith.constant dense<0.000000e+00> : vector<2x32xf32>
    %3 = tpu.matmul %1, %2, %cst {dimension_numbers = #tpu.dot_dimension_numbers<[1], [0], [0], [1], [0, 0, 1, 1], [], []>} : vector<2x32xbf16>, vector<32x32xbf16>, vector<2x32xf32> -> vector<2x32xf32>
    %c0_4 = arith.constant 0 : index
    %c0_5 = arith.constant 0 : index
    %4 = vector.load %arg2[%c0_4, %c0_5] : memref<1x32xf32, #tpu.memory_space<vmem>>, vector<1x32xf32>
    %5 = vector.broadcast %4 : vector<1x32xf32> to vector<2x32xf32>
    %6 = arith.addf %3, %5 : vector<2x32xf32>
    %7 = math.tanh %6 : vector<2x32xf32>
    %8 = arith.truncf %7 : vector<2x32xf32> to vector<2x32xbf16>
    %c0_6 = arith.constant 0 : index
    %c0_7 = arith.constant 0 : index
    %9 = vector.load %arg3[%c0_6, %c0_7] : memref<32x128xbf16, #tpu.memory_space<vmem>>, vector<32x128xbf16>
    %cst_8 = arith.constant dense<0.000000e+00> : vector<2x128xf32>
    %10 = tpu.matmul %8, %9, %cst_8 {dimension_numbers = #tpu.dot_dimension_numbers<[1], [0], [0], [1], [0, 0, 1, 1], [], []>} : vector<2x32xbf16>, vector<32x128xbf16>, vector<2x128xf32> -> vector<2x128xf32>
    %c0_9 = arith.constant 0 : index
    %c0_10 = arith.constant 0 : index
    %11 = vector.load %arg4[%c0_9, %c0_10] : memref<1x128xf32, #tpu.memory_space<vmem>>, vector<1x128xf32>
    %12 = vector.broadcast %11 : vector<1x128xf32> to vector<2x128xf32>
    %13 = arith.addf %10, %12 : vector<2x128xf32>
    %c0_11 = arith.constant 0 : index
    %c0_12 = arith.constant 0 : index
    %14 = vector.load %arg5[%c0_11, %c0_12] : memref<2x128xf32, #tpu.memory_space<vmem>>, vector<2x128xf32>
    tpu.vector_store %arg5[%c0_11, %c0_12], %13 {strides = array<i32>} : memref<2x128xf32, #tpu.memory_space<vmem>>, vector<2x128xf32>,
    return
  }
}

</mosaic_0001>

<bundles_post_ra>
// kernel: _lambda_.4
= control target key start
LH: loop header
LB: loop body
LE: loop exit
PB: predicated region body
PF: predicated region fallthrough
CT: control target
= control target key end

     0   :  { %vm18_vm0 = vcmask 261120   ;;  %vm70_vm1 = vcmask 257024   ;;  %s129_s0 = inlined_call_operand.vmem [shape: f32[16,32], index: 0, kind: input, shape index: {}]   ;;  %s130_s1 = inlined_call_operand.vmem [shape: f32[1,32], index: 1, kind: input, shape index: {}]   ;;  %s131_s2 = inlined_call_operand.vmem [shape: f32[1,32], index: 2, kind: input, shape index: {}]   ;;  %s132_s3 = inlined_call_operand.vmem [shape: bf16[16,32], index: 3, kind: output, shape index: {}]  }
   0x1   :  { %v14_v0 = vld [vmem:[%s129_s0] sm:$0xff]  ;;  %v15_v1 = vld [vmem:[%s129_s0 + $0x8] sm:$0xff] }
   0x2   :  { %v19_v2 = vsel %vm18_vm0, %v14_v0, 0.0  ;;  %v22_v3 = vsel %vm18_vm0, %v15_v1, 0.0  ;;  %v77_v21 = vld [vmem:[%s130_s1] ss:$0 sm:$0xff] }
   0x3   :  { %20 = vadd.xlane.f32.xlu0 %v19_v2  ;;  %v78_v23 = vld [vmem:[%s131_s2] ss:$0 sm:$0xff] }
   0x7   :  { %23 = vadd.xlane.f32.xlu0 %v22_v3 }
  0x90   :  { %v21_v4 = vpop.xlane.xlu0 %20 }
  0x91   :  { %v26_v5 = vmul.f32 0.03125, %v21_v4 }
  0x93   :  { %v28_v6 = vsub.f32 %v14_v0, %v26_v5 }
  0x94   :  { %v24_v7 = vpop.xlane.xlu0 %23 }
  0x95   :  { %v27_v8 = vmul.f32 0.03125, %v24_v7  ;;  %v30_v9 = vmul.f32 %v28_v6, %v28_v6 }
  0x97   :  { %v29_v10 = vsub.f32 %v15_v1, %v27_v8  ;;  %v32_v11 = vsel %vm18_vm0, %v30_v9, 0.0 }
  0x98   :  { %33 = vadd.xlane.f32.xlu1 %v32_v11 }
  0x99   :  { %v31_v12 = vmul.f32 %v29_v10, %v29_v10 }
  0x9b   :  { %v35_v13 = vsel %vm18_vm0, %v31_v12, 0.0 }
  0x9c   :  { %36 = vadd.xlane.f32.xlu1 %v35_v13 }
 0x125   :  { %v34_v14 = vpop.xlane.xlu1 %33 }
 0x126   :  { %v38_v15 = vmul.f32 0.03125, %v34_v14 }
 0x128   :  { %v40_v16 = vadd.f32 1e-12, %v38_v15 }
 0x129   :  { %v37_v17 = vpop.xlane.xlu1 %36 }
 0x12a   :  { %83 = vrsqrt.f32 %v40_v16  ;;  %v39_v18 = vmul.f32 0.03125, %v37_v17 }
 0x12c   :  { %v41_v19 = vadd.f32 1e-12, %v39_v18 }
 0x12e   :  { %85 = vrsqrt.f32 %v41_v19 }
 0x134   :  { %v84_v20 = vpop.eup %83 }
 0x135   :  { %v44_v22 = vmul.f32 %v84_v20, %v28_v6 }
 0x137   :  { %v52_v24 = vmul.f32 %v77_v21, %v44_v22 }
 0x138   :  { %v86_v25 = vpop.eup %85 }
 0x139   :  { %v60_v26 = vadd.f32 %v78_v23, %v52_v24  ;;  %v45_v27 = vmul.f32 %v86_v25, %v29_v10 }
 0x13b   :  { %v81_v28 = vpack.c.bf16 %v60_v26, %v60_v26  ;;  %v53_v29 = vmul.f32 %v77_v21, %v45_v27 }
 0x13d   :  { %71 = vst.msk [vmem:[%s132_s3] sm:$0xf] %vm70_vm1, %v81_v28  ;;  %v61_v30 = vadd.f32 %v78_v23, %v53_v29 }
 0x13f   :  { %v82_v31 = vpack.c.bf16 %v61_v30, %v61_v30 }
 0x141   :  { %72 = vst.msk [vmem:[%s132_s3 + $0x4] sm:$0xf] %vm70_vm1, %v82_v31 }

// kernel: _lambda_.7
= control target key start
LH: loop header
LB: loop body
LE: loop exit
PB: predicated region body
PF: predicated region fallthrough
CT: control target
= control target key end

     0   :  { %v47_v1 = vlaneseq  ;;  %v276_v2 = vmov 0.0   ;;  %vm277_vm0 = vmmov 0   ;;  %v278_v4 = vmov 1966171168   ;;  %s348_s0 = inlined_call_operand.vmem [shape: bf16[2,1,32], index: 0, kind: input, shape index: {}]   ;;  %s349_s1 = inlined_call_operand.vmem [shape: bf16[32,32], index: 1, kind: input, shape index: {}]   ;;  %s350_s2 = inlined_call_operand.vmem [shape: f32[1,32], index: 2, kind: input, shape index: {}]   ;;  %s351_s3 = inlined_call_operand.vmem [shape: bf16[32,128], index: 3, kind: input, shape index: {}]   ;;  %s352_s4 = inlined_call_operand.vmem [shape: f32[1,128], index: 4, kind: input, shape index: {}]   ;;  %s353_s5 = inlined_call_operand.hbm [shape: f32[2,128], index: 5, kind: output, shape index: {}]  }
   0x1   :  { %v246_v0 = vld [vmem:[%s349_s1] sm:$0xff]   ;;  %226 = vmatprep.subr.bf16.mxu0 %v276_v2  ;;  %234 = vmatprep.subr.bf16.mxu1 %v276_v2  ;;  %v247_v3 = vld [vmem:[%s349_s1 + $0x8] sm:$0xff]   ;;  %v45_v5 = vunpack.c.l.s4 %v278_v4 }
   0x2   :  { %227 = vmatpush3.bf16.msra.mxu0 %v246_v0  ;;  %230 = vmatprep.mubr.msk.bf16.mxu0 %vm277_vm0, %v276_v2  ;;  %v48_v6 = vshrl.u32 %v47_v1, 7  ;;  %v211_v7 = vld.sshfl [vmem:[%s348_s0] sm:$0x1 pattern:$0x75316420] }
   0x3   :  { %228 = vmatprep.subr.bf16.mxu0 %v276_v2  ;;  %238 = vmatprep.mubr.msk.bf16.mxu1 %vm277_vm0, %v276_v2  ;;  %v46_v8 = vunpack.c.0.s8 %v45_v5  ;;  %v212_v9 = vld.sshfl [vmem:[%s348_s0 + $0x1] sm:$0x1 pattern:$0x75316420] }
   0x6   :  { %229 = vmatpush3.bf16.msra.mxu0 %v247_v3 }
   0x7   :  { %10 = vsyncpa [#allocation3], 0  ;;  %v49_v10 = vsub.s32 %v46_v8, %v48_v6  ;;  %vm68_vm1 = vcmask 1041409   ;;  %vm83_vm2 = vcmask 261120   ;;  %v248_v18 = vld [vmem:[%s351_s3] sm:$0xff]   ;;  %v249_v19 = vld [vmem:[%s351_s3 + $0x8] sm:$0xff]  }
   0x8   :  { %235 = vmatpush3.bf16.msra.mxu1 %v248_v18  ;;  %v210_v20 = vld [vmem:[%s350_s2] ss:$0 sm:$0xff]  ;;  %s279_s3 = smov [#allocation2]  }
   0x9   :  { %v50_v11 = vrot.slane %v211_v7, %v49_v10  ;;  %v64_v12 = vrot.slane %v212_v9, %v49_v10  ;;  %236 = vmatprep.subr.bf16.mxu1 %v276_v2  ;;  %v216_v28 = vld [vmem:[%s352_s4] ss:$0 sm:$0xff]  ;;  %s202_s7 = sshll.u32 %s279_s3, 4  ;;  %s203_s7 = int_to_ptr.vmem [resolvable:$true] %s202_s7 }
   0xa   :  { %s252_s2 = scalar_lea.vmem %s203_s7, 32  ;;  %p257_p1 = scmp.lt.s32.totalorder %s203_s7, %s203_s7 }
   0xb   :  { %v65_v13 = vunpack.c.l.b16 %v50_v11  ;;  %v66_v14 = vunpack.c.l.b16 %v64_v12  ;;  %p253_p0 = scmp.ne.s32.totalorder %s203_s7, %s252_s2  ;;  %p258_p2 = scmp.lt.s32.totalorder %s252_s2, %s252_s2 }
   0xc   :  { %237 = vmatpush3.bf16.msra.mxu1 %v249_v19 }
   0xd   :  { %v67_v15 = vrot.slane %v66_v14, 7  ;;  %p259_p3 = por %p258_p2, %p257_p1 }
   0xf   :  { %v69_v16 = vsel %vm68_vm1, %v67_v15, %v65_v13  ;;  %p260_p4 = pnand %p259_p3, %p253_p0 }
  0x10   :  { %v70_v17 = vpack.c.b16 %v69_v16, %v69_v16 }
  0x12   :  { %231 = vmatmul.mubr.msk.bf16.vlgmr.msra.gmra.mrb[0].mxu0 %vm83_vm2, %v70_v17 }
  0xe5   :  { %v121_v21 = vpop.f32.mrb[0].mxu0 }
  0xe6   :  { %v122_v22 = vadd.f32 %v210_v20, %v121_v21  ;;  %v232_v23 = vpop.f32.mrb[1].mxu0 }
  0xe7   :  { %v124_v24 = vpop.f32.mrb[2].mxu0 }
  0xe8   :  { %250 = vtanh.f32 %v122_v22  ;;  %v233_v25 = vpop.f32.mrb[3].mxu0 }
  0xf2   :  { %v251_v26 = vpop.eup %250 }
  0xf3   :  { %v128_v27 = vpack.c.bf16 %v251_v26, %v251_v26 }
  0xf5   :  { %239 = vmatmul.mubr.msk.bf16.vlgmr.msra.gmra.mrb[0].mxu1 %vm83_vm2, %v128_v27 }
 0x1c8   :  { %v189_v29 = vpop.f32.mrb[0].mxu1 }
 0x1c9   :  { %v190_v30 = vadd.f32 %v216_v28, %v189_v29  ;;  %v240_v31 = vpop.f32.mrb[1].mxu1 }
 0x1ca   :  { %v192_v32 = vpop.f32.mrb[2].mxu1 }
 0x1cb   :  { %195 = vst [vmem:[#allocation2] sm:$0x3] %v190_v30  ;;  %v241_v33 = vpop.f32.mrb[3].mxu1 }
 0x1cc   :  { %263 = shalt.err (!%p260_p4)
}
 0x1cd   :  { %s264_s4 = scalar_lea.hbm %s353_s5, 32 }
 0x1ce   :  { %p265_p5 = scmp.ne.s32.totalorder %s353_s5, %s264_s4  ;;  %p268_p6 = scmp.lt.u32.totalorder %s264_s4, %s353_s5 }
 0x1d0   :  { %p270_p7 = pnand %p268_p6, %p265_p5 }
 0x1d2   :  { %273 = shalt.err (!%p270_p7)
}
 0x1d3   :  { %205 = dma.vmem_to_hbm [thread:$0]  %s203_s7, 32, %s353_s5, [#allocation3]  }
 0x1d4   :  { %274 = dma.done.wait [#allocation3], 32  }
 0x1d5   :  { %275 = vsyncadd [#allocation3], 4294967264 }
 0x1d6   :  { %209 = vsyncpa [#allocation3], 1 }

// kernel: _lambda_.5
= control target key start
LH: loop header
LB: loop body
LE: loop exit
PB: predicated region body
PF: predicated region fallthrough
CT: control target
= control target key end

     0   :  { %s1388_s29 = smov 0   ;;  %s1522_s0 = inlined_call_operand.vmem [shape: bf16[2,8,32], index: 0, kind: input, shape index: {}]   ;;  %s1523_s1 = inlined_call_operand.vmem [shape: f32[2,1,8], index: 1, kind: input, shape index: {}]   ;;  %s1524_s2 = inlined_call_operand.vmem [shape: bf16[32,96], index: 2, kind: input, shape index: {}]   ;;  %s1525_s3 = inlined_call_operand.vmem [shape: f32[1,96], index: 3, kind: input, shape index: {}]   ;;  %s1526_s4 = inlined_call_operand.vmem [shape: bf16[32,32], index: 4, kind: input, shape index: {}]   ;;  %s1527_s5 = inlined_call_operand.vmem [shape: f32[1,32], index: 5, kind: input, shape index: {}]   ;;  %s1528_s6 = inlined_call_operand.vmem [shape: f32[1,32], index: 6, kind: input, shape index: {}]   ;;  %s1529_s7 = inlined_call_operand.vmem [shape: f32[1,32], index: 7, kind: input, shape index: {}]   ;;  %s1530_s8 = inlined_call_operand.vmem [shape: bf16[32,64], index: 8, kind: input, shape index: {}]   ;;  %s1531_s9 = inlined_call_operand.vmem [shape: f32[1,64], index: 9, kind: input, shape index: {}]   ;;  %s1532_s10 = inlined_call_operand.vmem [shape: bf16[64,32], index: 10, kind: input, shape index: {}]   ;;  %s1533_s11 = inlined_call_operand.vmem [shape: f32[1,32], index: 11, kind: input, shape index: {}]   ;;  %s1534_s12 = inlined_call_operand.vmem [shape: f32[1,32], index: 12, kind: input, shape index: {}]   ;;  %s1535_s13 = inlined_call_operand.vmem [shape: f32[1,32], index: 13, kind: input, shape index: {}]   ;;  %s1536_s14 = inlined_call_operand.vmem [shape: bf16[2,8,32], index: 14, kind: output, shape index: {}]  }
   0x1 LB: > { %s1139_s30 = sadd.s32 4294967295, %s1303_s29   ;;  %p1143_p0 = scmp.ge.s32.totalorder %s1303_s29, 1  ;;  %s1303_s29 = sphi %s1388_s29, %s24_s29  }
   0x2   : > { %p419_p1 = scmp.lt.s32.totalorder %s1303_s29, 3 }
   0x4   : > { %p420_p2 = pnand %p1143_p0, %p419_p1 }
   0x5   : > { %v1273_v0 = vld [vmem:[%s1524_s2] sm:$0xff] (!%p420_p2)   ;;  %v1305_v1 = vmov (!%p420_p2), 0.0   ;;  %v1274_v2 = vld [vmem:[%s1524_s2 + $0x8] sm:$0xff] (!%p420_p2)   ;;  %vm1306_vm0 = vmmov (!%p420_p2), 0   ;;  %p466_p3 = scmp.lt.s32.totalorder (!%p420_p2), %s1139_s30, 1  ;;  %vm503_vm1 = vcmask (!%p420_p2), 261120  }
   0x6   : > { %423 = sbr.rel (%p420_p2) target bundleno = 2532 (0x9e4), region = 76  ;;  %1197 = vmatprep.subr.bf16.mxu0 (!%p420_p2), %v1305_v1  ;;  %1205 = vmatprep.subr.bf16.mxu1 (!%p420_p2), %v1305_v1  ;;  %v1146_v4 = vld [vmem:[%s1525_s3] ss:$0 sm:$0xff] (!%p420_p2)  ;;  %s1307_s25 = smov (!%p420_p2), 112   ;;  %vm551_vm2 = vcmask (!%p420_p2), 130048   ;;  %vm606_vm3 = vcmask (!%p420_p2), 64512  }
   0x7   : > { %1198 = vmatpush3.bf16.msra.mxu0 (!%p420_p2), %v1273_v0  ;;  %1201 = vmatprep.mubr.msk.bf16.mxu0 (!%p420_p2), %vm1306_vm0, %v1305_v1  ;;  %s1308_s26 = smov (!%p420_p2), 96   ;;  %s1309_s27 = smov (!%p420_p2), 80   ;;  %vm624_vm4 = vcmask (!%p420_p2), 1043456   ;;  %v1275_v53 = vld [vmem:[%s1526_s4] sm:$0xff] (!%p420_p2)   ;;  %v1276_v54 = vld [vmem:[%s1526_s4 + $0x8] sm:$0xff] (!%p420_p2)   ;;  %vm1000_vm5 = vcmask (!%p420_p2), 523264  }
   0x8   : > { %1199 = vmatprep.subr.bf16.mxu0 (!%p420_p2), %v1305_v1  ;;  %1207 = vmatprep.mubr.msk.bf16.mxu1 (!%p420_p2), %vm1306_vm0, %v1305_v1  ;;  %s1310_s17 = smov (!%p420_p2), 64   ;;  %s1311_s18 = smov (!%p420_p2), 48   ;;  %vm1075_vm6 = vcmask (!%p420_p2), 257024  }
   0x9   : > { %s1312_s24 = smov (!%p420_p2), 16  }
   0xb   : > { %1200 = vmatpush3.bf16.msra.mxu0 (!%p420_p2), %v1274_v2 }
   0xc   : > { %1211 = vmatprep.subr.bf16.mxu0 (!%p420_p2), %v1305_v1 }
   0xd   : > { %s1538_s30 = smov (!%p466_p3, %s1139_s30), 1 }
   0xe   : > { %s1144_s19 = sshll.u32 %s1538_s30, 2  ;;  %s472_s16 = scalar_lea.vmem %s1523_s1, %s1538_s30 }
   0xf   : > { %s469_s22 = scalar_lea.vmem %s1522_s0, %s1144_s19  ;;  %v1151_v17 = vld [vmem:[%s472_s16] ss:$0 sm:$0xff] }
  0x10   : > { %v1418_v3 = vld [vmem:[%s469_s22] sm:$0xf] }
  0x11   : > { %1202 = vmatmul.mubr.msk.bf16.vlgmr.msra.gmra.mrb[0].mxu0 %vm503_vm1, %v1418_v3 }
  0x12   : > { %1213 = vmatprep.mubr.msk.bf16.mxu0 %vm1306_vm0, %v1305_v1 }
  0xe4   : > { %v541_v5 = vpop.f32.mrb[0].mxu0 }
  0xe5   : > { %v542_v6 = vadd.f32 %v1146_v4, %v541_v5  ;;  %v1203_v7 = vpop.f32.mrb[1].mxu0  ;;  %v1155_v4 = vld [vmem:[%s1527_s5] ss:$0 sm:$0xff]  ;;  %v852_v5 = vunpack.c.l.bf16 %v1418_v3 }
  0xe6   : > { %v544_v8 = vpop.f32.mrb[2].mxu0  ;;  %v1277_v3 = vld [vmem:[%s1530_s8] sm:$0xff]  }
  0xe7   : > { %v547_v9 = vpack.c.bf16 %v542_v6, %v542_v6  ;;  %v1204_v10 = vpop.f32.mrb[3].mxu0 }
  0xe9   : > { %668 = vrot.lane.b32.xlu1 %v547_v9, %s1307_s25  ;;  %549 = vrot.lane.b32.xlu0 %v547_v9, %s1308_s26 }
  0xed   : > { %670 = vrot.lane.b32.xlu0 %v547_v9, %s1309_s27  ;;  %s476_s27 = scalar_lea.vmem %s1536_s14, %s1144_s19 }
 0x15b   : > { %v550_v11 = vpop.permute.xlu0 %549  ;;  %v669_v15 = vpop.permute.xlu1 %668 }
 0x15c   : > { %v556_v12 = vsel %vm551_vm2, %v550_v11, 0 }
 0x15d   : > { %1206 = vmatpush3.bf16.xpose.msra.mxu1 %v556_v12 }
 0x15e   : > { %1217 = vmatprep.subr.bf16.mxu1 %v1305_v1 }
 0x15f   : > { %v671_v13 = vpop.permute.xlu0 %670 }
 0x160   : > { %v676_v14 = vsel %vm551_vm2, %v671_v13, 0 }
 0x164   : > { %1208 = vmatmul.mubr.msk.bf16.vlgmr.msra.gmra.mrb[0].mxu1 %vm551_vm2, %v547_v9 }
 0x165   : > { %1218 = vmatpush3.bf16.xpose.msra.mxu1 %v676_v14  ;;  %1219 = vmatprep.mubr.msk.bf16.mxu1 %vm1306_vm0, %v1305_v1 }
 0x166   : > { %1229 = vmatprep.subr.bf16.mxu1 %v1305_v1 }
 0x16c   : > { %1220 = vmatmul.mubr.msk.bf16.vlgmr.msra.gmra.mrb[4].mxu1 %vm551_vm2, %v669_v15 }
 0x16d   : > { %1233 = vmatprep.mubr.msk.bf16.mxu1 %vm1306_vm0, %v1305_v1  ;;  %1230 = vmatpush3.bf16.msra.mxu1 %v1275_v53 }
 0x16e   : > { %1231 = vmatprep.subr.bf16.mxu1 %v1305_v1 }
 0x171   : > { %1232 = vmatpush3.bf16.msra.mxu1 %v1276_v54 }
 0x172   : > { %1245 = vmatprep.subr.bf16.mxu1 %v1305_v1 }
 0x237   : > { %v592_v16 = vpop.f32.mrb[0].mxu1 }
 0x238   : > { %v598_v18 = vmul.f32 0.25, %v592_v16  ;;  %v1209_v19 = vpop.f32.mrb[1].mxu1 }
 0x239   : > { %v595_v20 = vpop.f32.mrb[2].mxu1 }
 0x23a   : > { %v1210_v21 = vpop.f32.mrb[3].mxu1  ;;  %v605_v22 = vadd.f32 %v1151_v17, %v598_v18  ;;  %v1278_v18 = vld [vmem:[%s1530_s8 + $0x8] sm:$0xff]  }
 0x23c   : > { %v607_v23 = vsel %vm606_vm3, %v605_v22, -inf }
 0x23d   : > { %608 = vmax.xlane.f32.xlu1 %v607_v23  ;;  %v1159_v23 = vld [vmem:[%s1528_s6] ss:$0 sm:$0xff] }
 0x23f   : > { %v712_v24 = vpop.f32.mrb[4].mxu1 }
 0x240   : > { %v718_v25 = vmul.f32 0.25, %v712_v24  ;;  %v1221_v26 = vpop.f32.mrb[5].mxu1 }
 0x241   : > { %v715_v27 = vpop.f32.mrb[6].mxu1 }
 0x242   : > { %v1222_v28 = vpop.f32.mrb[7].mxu1  ;;  %v719_v29 = vadd.f32 %v1151_v17, %v718_v25  ;;  %v1160_v25 = vld [vmem:[%s1529_s7] ss:$0 sm:$0xff] }
 0x244   : > { %v720_v30 = vsel %vm606_vm3, %v719_v29, -inf }
 0x245   : > { %721 = vmax.xlane.f32.xlu0 %v720_v30  ;;  %v1280_v30 = vld [vmem:[%s1532_s10 + $0x8] sm:$0xff]  }
 0x2ca   : > { %v609_v31 = vpop.xlane.xlu1 %608 }
 0x2cb   : > { %v610_v32 = vsub.f32 %v605_v22, %v609_v31  ;;  %v1281_v31 = vld [vmem:[%s1532_s10 + $0x10] sm:$0xff]  }
 0x2cd   : > { %v611_v33 = vmul.f32 1.442695, %v610_v32  ;;  %v1282_v32 = vld [vmem:[%s1532_s10 + $0x18] sm:$0xff]  }
 0x2cf   : > { %1283 = vpow2.f32 %v611_v33  ;;  %v1161_v33 = vld [vmem:[%s1531_s9] ss:$0 sm:$0xff] }
 0x2d2   : > { %v722_v34 = vpop.xlane.xlu0 %721 }
 0x2d3   : > { %v723_v35 = vsub.f32 %v719_v29, %v722_v34  ;;  %v1279_v29 = vld [vmem:[%s1532_s10] sm:$0xff]  }
 0x2d5   : > { %v724_v36 = vmul.f32 1.442695, %v723_v35 }
 0x2d7   : > { %1285 = vpow2.f32 %v724_v36 }
 0x2d9   : > { %v1284_v37 = vpop.eup %1283 }
 0x2da   : > { %v613_v38 = vsel %vm606_vm3, %v1284_v37, 0.0 }
 0x2db   : > { %614 = vadd.xlane.f32.xlu0 %v613_v38 }
 0x2e1   : > { %v1286_v39 = vpop.eup %1285 }
 0x2e2   : > { %v726_v40 = vsel %vm606_vm3, %v1286_v39, 0.0 }
 0x2e3   : > { %727 = vadd.xlane.f32.xlu1 %v726_v40 }
 0x2f1   : > { %619 = vrot.lane.b32.xlu0 %v547_v9, %s1310_s17 }
 0x2f4   : > { %732 = vrot.lane.b32.xlu1 %v547_v9, %s1311_s18 }
 0x368   : > { %v615_v41 = vpop.xlane.xlu0 %614 }
 0x369   : > { %1287 = vrcp.f32 %v615_v41 }
 0x36c   : > { %v620_v42 = vpop.permute.xlu0 %619 }
 0x36d   : > { %v626_v43 = vsel %vm624_vm4, %v620_v42, 0 }
 0x36e   : > { %1212 = vmatpush3.bf16.msra.mxu0 %v626_v43 }
 0x36f   : > { %1223 = vmatprep.subr.bf16.mxu0 %v1305_v1 }
 0x370   : > { %v728_v44 = vpop.xlane.xlu1 %727 }
 0x371   : > { %1289 = vrcp.f32 %v728_v44 }
 0x373   : > { %v1288_v45 = vpop.eup %1287 }
 0x374   : > { %v617_v46 = vmul.f32 %v1288_v45, %v1284_v37  ;;  %v733_v47 = vpop.permute.xlu1 %732 }
 0x375   : > { %v738_v49 = vsel %vm624_vm4, %v733_v47, 0 }
 0x376   : > { %v618_v48 = vpack.c.bf16 %v617_v46, %v617_v46 }
 0x378   : > { %1214 = vmatmul.mubr.msk.bf16.vlgmr.msra.gmra.mrb[4].mxu0 %vm606_vm3, %v618_v48  ;;  %v1165_v48 = vld [vmem:[%s1533_s11] ss:$0 sm:$0xff] }
 0x379   : > { %1224 = vmatpush3.bf16.msra.mxu0 %v738_v49  ;;  %1225 = vmatprep.mubr.msk.bf16.mxu0 %vm1306_vm0, %v1305_v1 }
 0x37a   : > { %1237 = vmatprep.subr.bf16.mxu0 %v1305_v1 }
 0x37b   : > { %v1290_v50 = vpop.eup %1289 }
 0x37c   : > { %v730_v51 = vmul.f32 %v1290_v50, %v1286_v39 }
 0x37e   : > { %v731_v52 = vpack.c.bf16 %v730_v51, %v730_v51 }
 0x380   : > { %1226 = vmatmul.mubr.msk.bf16.vlgmr.msra.gmra.mrb[8].mxu0 %vm606_vm3, %v731_v52 }
 0x381   : > { %1241 = vmatprep.mubr.msk.bf16.mxu0 %vm1306_vm0, %v1305_v1  ;;  %1238 = vmatpush3.bf16.msra.mxu0 %v1277_v3 }
 0x382   : > { %1239 = vmatprep.subr.bf16.mxu0 %v1305_v1 }
 0x385   : > { %1240 = vmatpush3.bf16.msra.mxu0 %v1278_v18 }
 0x44b   : > { %v662_v55 = vpop.f32.mrb[4].mxu0 }
 0x44c   : > { %v1215_v56 = vpop.f32.mrb[5].mxu0 }
 0x44d   : > { %v665_v57 = vpop.f32.mrb[6].mxu0 }
 0x44e   : > { %v1216_v58 = vpop.f32.mrb[7].mxu0 }
 0x453   : > { %v774_v59 = vpop.f32.mrb[8].mxu0 }
 0x454   : > { %781 = vrot.lane.b32.xlu1 %v774_v59, %s1312_s24  ;;  %v1227_v60 = vpop.f32.mrb[9].mxu0 }
 0x455   : > { %v777_v61 = vpop.f32.mrb[10].mxu0 }
 0x456   : > { %v1228_v62 = vpop.f32.mrb[11].mxu0 }
 0x4c6   : > { %v782_v63 = vpop.permute.xlu1 %781 }
 0x4c7   : > { %v784_v0 = vsel %vm551_vm2, %v662_v55, %v782_v63 }
 0x4c8   : > { %v785_v2 = vpack.c.bf16 %v784_v0, %v784_v0 }
 0x4ca   : > { %1234 = vmatmul.mubr.msk.bf16.vlgmr.msra.gmra.mrb[8].mxu1 %vm503_vm1, %v785_v2  ;;  %v1171_v2 = vld [vmem:[%s1534_s12] ss:$0 sm:$0xff] }
 0x4cb   : > { %1253 = vmatprep.mubr.msk.bf16.mxu1 %vm1306_vm0, %v1305_v1  ;;  %1246 = vmatpush3.bf16.msra.mxu1 %v1279_v29 }
 0x4cc   : > { %1247 = vmatprep.subr.bf16.mxu1 %v1305_v1 }
 0x4cf   : > { %1248 = vmatpush3.bf16.msra.mxu1 %v1280_v30 }
 0x4d0   : > { %1249 = vmatprep.subr.bf16.mxu1 %v1305_v1 }
 0x4d3   : > { %1250 = vmatpush3.bf16.msra.mxu1 %v1281_v31 }
 0x4d4   : > { %1251 = vmatprep.subr.bf16.mxu1 %v1305_v1 }
 0x4d7   : > { %1252 = vmatpush3.bf16.msra.mxu1 %v1282_v32 }
 0x59d   : > { %v846_v6 = vpop.f32.mrb[8].mxu1 }
 0x59e   : > { %v847_v7 = vadd.f32 %v1155_v4, %v846_v6  ;;  %v1235_v8 = vpop.f32.mrb[9].mxu1 }
 0x59f   : > { %v849_v9 = vpop.f32.mrb[10].mxu1 }
 0x5a0   : > { %v1236_v10 = vpop.f32.mrb[11].mxu1  ;;  %v853_v11 = vadd.f32 %v852_v5, %v847_v7  ;;  %v1172_v5 = vld [vmem:[%s1535_s13] ss:$0 sm:$0xff] }
 0x5a2   : > { %v856_v12 = vsel %vm503_vm1, %v853_v11, 0.0 }
 0x5a3   : > { %857 = vadd.xlane.f32.xlu0 %v856_v12 }
 0x630   : > { %v858_v13 = vpop.xlane.xlu0 %857 }
 0x631   : > { %v860_v14 = vmul.f32 0.03125, %v858_v13 }
 0x633   : > { %v861_v15 = vsub.f32 %v853_v11, %v860_v14 }
 0x635   : > { %v862_v16 = vmul.f32 %v861_v15, %v861_v15 }
 0x637   : > { %v863_v17 = vsel %vm503_vm1, %v862_v16, 0.0 }
 0x638   : > { %864 = vadd.xlane.f32.xlu1 %v863_v17 }
 0x6c5   : > { %v865_v19 = vpop.xlane.xlu1 %864 }
 0x6c6   : > { %v866_v20 = vmul.f32 0.03125, %v865_v19 }
 0x6c8   : > { %v867_v21 = vadd.f32 1e-12, %v866_v20 }
 0x6ca   : > { %1291 = vrsqrt.f32 %v867_v21 }
 0x6d4   : > { %v1292_v22 = vpop.eup %1291 }
 0x6d5   : > { %v869_v24 = vmul.f32 %v1292_v22, %v861_v15 }
 0x6d7   : > { %v876_v26 = vmul.f32 %v1159_v23, %v869_v24 }
 0x6d9   : > { %v883_v27 = vadd.f32 %v1160_v25, %v876_v26 }
 0x6db   : > { %v884_v28 = vpack.c.bf16 %v883_v27, %v883_v27 }
 0x6dd   : > { %1242 = vmatmul.mubr.msk.bf16.vlgmr.msra.gmra.mrb[12].mxu0 %vm503_vm1, %v884_v28 }
 0x7b0   : > { %v945_v34 = vpop.f32.mrb[12].mxu0 }
 0x7b1   : > { %v946_v35 = vadd.f32 %v1161_v33, %v945_v34  ;;  %v1243_v36 = vpop.f32.mrb[13].mxu0 }
 0x7b2   : > { %v948_v37 = vpop.f32.mrb[14].mxu0 }
 0x7b3   : > { %v951_v38 = vmul.f32 %v946_v35, %v946_v35  ;;  %v1244_v39 = vpop.f32.mrb[15].mxu0 }
 0x7b5   : > { %v952_v40 = vmul.f32 %v951_v38, %v946_v35 }
 0x7b7   : > { %v953_v41 = vmul.f32 0.044715, %v952_v40 }
 0x7b9   : > { %v954_v42 = vadd.f32 %v953_v41, %v946_v35 }
 0x7bb   : > { %v955_v43 = vmul.f32 0.7978846, %v954_v42 }
 0x7bd   : > { %1293 = vtanh.f32 %v955_v43 }
 0x7c7   : > { %v1294_v1 = vpop.eup %1293 }
 0x7c8   : > { %v957_v44 = vadd.f32 1.0, %v1294_v1 }
 0x7ca   : > { %v958_v45 = vmul.f32 0.5, %v957_v44 }
 0x7cc   : > { %v959_v46 = vmul.f32 %v958_v45, %v946_v35 }
 0x7ce   : > { %v960_v47 = vpack.c.bf16 %v959_v46, %v959_v46 }
 0x7d0   : > { %1254 = vmatmul.mubr.msk.bf16.vlgmr.msra.gmra.mrb[12].mxu1 %vm1000_vm5, %v960_v47 }
 0x8a3   : > { %v1038_v49 = vpop.f32.mrb[12].mxu1 }
 0x8a4   : > { %v1039_v50 = vadd.f32 %v1165_v48, %v1038_v49  ;;  %v1255_v51 = vpop.f32.mrb[13].mxu1 }
 0x8a5   : > { %v1041_v52 = vpop.f32.mrb[14].mxu1 }
 0x8a6   : > { %v1256_v53 = vpop.f32.mrb[15].mxu1  ;;  %v1044_v54 = vadd.f32 %v1039_v50, %v883_v27 }
 0x8a8   : > { %v1047_v55 = vsel %vm503_vm1, %v1044_v54, 0.0 }
 0x8a9   : > { %1048 = vadd.xlane.f32.xlu0 %v1047_v55 }
 0x936   : > { %v1049_v56 = vpop.xlane.xlu0 %1048 }
 0x937   : > { %v1050_v57 = vmul.f32 0.03125, %v1049_v56 }
 0x939   : > { %v1051_v58 = vsub.f32 %v1044_v54, %v1050_v57 }
 0x93b   : > { %v1052_v59 = vmul.f32 %v1051_v58, %v1051_v58 }
 0x93d   : > { %v1053_v60 = vsel %vm503_vm1, %v1052_v59, 0.0 }
 0x93e   : > { %1054 = vadd.xlane.f32.xlu0 %v1053_v60 }
 0x9cb   : > { %v1055_v61 = vpop.xlane.xlu0 %1054 }
 0x9cc   : > { %v1056_v62 = vmul.f32 0.03125, %v1055_v61 }
 0x9ce   : > { %v1057_v63 = vadd.f32 1e-12, %v1056_v62 }
 0x9d0   : > { %1295 = vrsqrt.f32 %v1057_v63 }
 0x9da   : > { %v1296_v0 = vpop.eup %1295 }
 0x9db   : > { %v1059_v4 = vmul.f32 %v1296_v0, %v1051_v58 }
 0x9dd   : > { %v1066_v6 = vmul.f32 %v1171_v2, %v1059_v4 }
 0x9df   : > { %v1073_v7 = vadd.f32 %v1172_v5, %v1066_v6 }
 0x9e1   : > { %v1074_v8 = vpack.c.bf16 %v1073_v7, %v1073_v7 }
 0x9e3   : > { %1076 = vst.msk [vmem:[%s476_s27] sm:$0xf] %vm1075_vm6, %v1074_v8 }
 0x9e4 PF: > { %s24_s29 = sadd.s32 1, %s1303_s29  }
 0x9e5   : > { %p21_p4 = scmp.ge.s32.totalorder %s24_s29, 4  }
 0x9e7   :  { %23 = sbr.rel (!%p21_p4) target bundleno = 1 (0x1), region = 109 }

</bundles_post_ra>
